<compile_context>
chip_gen: v7x
topology: tpu7x:2x2x1
jax: 0.10.0
libtpu: 0.0.40
codegen_flags: <defaults>
</compile_context>

<pallas_src>
import functools

import jax
import jax.numpy as jnp
from jax.experimental import pallas as pl
from jax.experimental.pallas import tpu as pltpu


def _cdiv(a, b):
    return -(-a // b)


def _round_up(a, b):
    return _cdiv(a, b) * b


def _gray_color_sum_kernel(x_ref, o_ref, csum_ref, *, true_hw, thw, g_hw_inner,
                           mask_tail):
    """x_ref: (rows_b, thw) slab of the (N*3, H*W) tensor.
    o_ref: (1, rows_b, 128) per-row channel-sum output tile.
    csum_ref: (rows_b, 1) f32 running channel sums (VMEM scratch)."""
    p = pl.program_id(0)          # H*W split (v7x dual-core), usually size 1
    j = pl.program_id(2)          # H*W block within split (reduction axis)

    @pl.when(j == 0)
    def _():
        csum_ref[...] = jnp.zeros_like(csum_ref)

    x = x_ref[...].astype(jnp.float32)
    if mask_tail:
        # The last H*W block is ragged: zero out lanes past the true extent.
        off = (p * g_hw_inner + j) * thw
        lane = jax.lax.broadcasted_iota(jnp.int32, x.shape, 1)
        x = jnp.where(lane + off < true_hw, x, 0.0)

    # Fused per-row partial sum over this H*W chunk, accumulated in f32.
    csum_ref[...] += jnp.sum(x, axis=-1, keepdims=True)

    @pl.when(j == pl.num_programs(2) - 1)
    def _():
        o_ref[...] = jnp.broadcast_to(csum_ref[...], o_ref.shape)


def _target_block_bytes():
    """Per-generation HBM-streaming block target (true bytes, post layout fix)."""
    try:
        info = pltpu.get_tpu_info()
        vmem = int(getattr(info, "vmem_capacity_bytes", 0))
    except Exception:
        vmem = 0
    if vmem == 0:
        return 4 * 1024 * 1024               # unknown: conservative
    if vmem <= 80 * 1024 * 1024:             # v7x: 64 MiB VMEM, ~3.2 TB/s HBM
        return 8 * 1024 * 1024
    return 6 * 1024 * 1024                   # v5e / v6e: 128 MiB VMEM


def _pick_tiles(n3, hw, itemsize, target_bytes):
    """Choose (rows_b, thw): rows (images*channels) and H*W lanes per block."""
    if n3 * hw * itemsize <= target_bytes:
        return int(n3), int(hw)               # everything fits one block
    # Prefer tiling rows only: full-width rows give fully contiguous DMAs.
    if 8 * hw * itemsize <= target_bytes:
        rows_b = (target_bytes // (hw * itemsize)) // 8 * 8
        return int(rows_b), int(hw)
    # Even an 8-row slab is over budget: tile H*W as well.
    rows_b = n3 if n3 < 8 else 8
    thw = (target_bytes // (rows_b * itemsize)) // 128 * 128
    thw = max(thw, max(128, 2048 // itemsize))   # >= 2 KiB per row segment
    thw = min(thw, _round_up(hw, 128))
    return int(rows_b), int(thw)


def gray_color(x, target_block_bytes=None):
    """Pallas TPU implementation of the gray_color loss.

    Args:
      x: [N, 3, H, W] image batch (NCHW), float32 or bfloat16.
      target_block_bytes: optional per-block streaming size override (test hook).
    Returns:
      f32 scalar.
    """
    n, c, h, w = x.shape
    assert c == 3, "gray_color expects 3 channels (RGB)"
    hw = h * w
    n3 = n * 3

    # Sublane- and lane-dense layout: (N*3, H*W). Free reshape for NCHW.
    x2 = x.reshape(n3, hw)

    itemsize = jnp.dtype(x.dtype).itemsize
    if target_block_bytes is None:
        target_block_bytes = _target_block_bytes()
    rows_b, thw = _pick_tiles(n3, hw, itemsize, target_block_bytes)

    g_r = _cdiv(n3, rows_b)                  # row-block axis ("parallel")
    g_hw = _cdiv(hw, thw)                    # H*W reduction axis
    # Single row block => split H*W into two outer parallel halves so both
    # TensorCores participate on dual-core chips (v7x). No-op on 1-TC chips.
    n_splits = 2 if (g_r == 1 and g_hw >= 2 and g_hw % 2 == 0) else 1
    g_hw_inner = g_hw // n_splits
    mask_tail = (hw % thw) != 0
    n3_out = g_r * rows_b

    # Exact VMEM budget: double-buffered input slab + output tile + scratch.
    sub = 8 * max(1, 4 // itemsize)          # sublane packing: f32 -> 8, bf16 -> 16
    in_blk = _round_up(rows_b, sub) * _round_up(thw, 128) * itemsize
    out_blk = _round_up(rows_b, 8) * 128 * 4
    scratch = _round_up(rows_b, 8) * 128 * 4
    vmem_needed = 2 * in_blk + 2 * out_blk + scratch + (2 << 20)
    vmem_limit = int(min(max(vmem_needed, 32 << 20), 56 << 20))

    kernel = functools.partial(
        _gray_color_sum_kernel,
        true_hw=hw, thw=thw, g_hw_inner=g_hw_inner, mask_tail=mask_tail)

    partial_sums = pl.pallas_call(
        kernel,
        out_shape=jax.ShapeDtypeStruct((n_splits, n3_out, 128), jnp.float32),
        grid=(n_splits, g_r, g_hw_inner),
        in_specs=[pl.BlockSpec((rows_b, thw),
                               lambda p, i, j: (i, p * g_hw_inner + j))],
        out_specs=pl.BlockSpec((1, rows_b, 128), lambda p, i, j: (p, i, 0)),
        scratch_shapes=[pltpu.VMEM((rows_b, 1), jnp.float32)],
        compiler_params=pltpu.CompilerParams(
            dimension_semantics=("parallel", "parallel", "arbitrary"),
            vmem_limit_bytes=vmem_limit),
    )(x2)

    # Tiny epilogue on N*3 numbers: channel means -> per-image k -> batch mean.
    csum = jnp.sum(partial_sums[:, :, 0], axis=0)[:n3]        # (N*3,)
    m = csum.reshape(n, 3) * (1.0 / float(hw))                 # channel means
    mr, mg, mb = m[:, 0], m[:, 1], m[:, 2]
    drg = (mr - mg) ** 2
    drb = (mr - mb) ** 2
    dgb = (mb - mg) ** 2
    k = jnp.sqrt(drg * drg + drb * drb + dgb * dgb)
    return jnp.mean(k)


def _reference(x):
    # Pure-JAX reference mirroring the PyTorch forward.
    mean_rgb = jnp.mean(x.astype(jnp.float32), axis=(2, 3), keepdims=True)
    mr = mean_rgb[:, 0:1]
    mg = mean_rgb[:, 1:2]
    mb = mean_rgb[:, 2:3]
    drg = (mr - mg) ** 2
    drb = (mr - mb) ** 2
    dgb = (mb - mg) ** 2
    k = jnp.sqrt(drg ** 2 + drb ** 2 + dgb ** 2)
    return jnp.mean(k)


if __name__ == "__main__":
    key = jax.random.PRNGKey(0)

    # Primary small case consistent with the module: batch=2, 3 channels, 16x16.
    x = jax.random.uniform(key, (2, 3, 16, 16), dtype=jnp.float32)
    out = jax.block_until_ready(gray_color(x))
    ref = _reference(x)
    assert jnp.allclose(out, ref, rtol=1e-5, atol=1e-6), (out, ref)

    # Exercise the tiled paths with a tiny forced block budget:
    # rows tiled in 8s with a partial row block, H*W tiled with a ragged
    # masked tail (40*60 = 2400, not a multiple of 128).
    xb = jax.random.uniform(jax.random.PRNGKey(1), (4, 3, 40, 60), dtype=jnp.float32)
    outb = jax.block_until_ready(gray_color(xb, target_block_bytes=64 * 1024))
    refb = _reference(xb)
    assert jnp.allclose(outb, refb, rtol=1e-5, atol=1e-6), (outb, refb)

    # Exercise the dual-core H*W split (single row block, even # of hw blocks).
    xc = jax.random.uniform(jax.random.PRNGKey(2), (1, 3, 32, 64), dtype=jnp.float32)
    outc = jax.block_until_ready(gray_color(xc, target_block_bytes=8 * 1024))
    refc = _reference(xc)
    assert jnp.allclose(outc, refc, rtol=1e-5, atol=1e-6), (outc, refc)

    print("KERNEL_OK")
</pallas_src>

<mosaic_0001>
module attributes {stable_mosaic.version = 11 : i64} {
  func.func @_gray_color_sum_kernel(%arg0: i32, %arg1: i32, %arg2: i32, %arg3: memref<6x256xf32, #tpu.memory_space<vmem>>, %arg4: memref<1x6x128xf32, #tpu.memory_space<vmem>>, %arg5: memref<6x1xf32, #tpu.memory_space<vmem>>) attributes {dimension_semantics = [#tpu.dimension_semantics<parallel>, #tpu.dimension_semantics<parallel>, #tpu.dimension_semantics<arbitrary>], iteration_bounds = array<i64: 1, 1, 1>, scalar_prefetch = 0 : i64, scratch_operands = 1 : i64, tpu.core_type = #tpu.core_type<tc>, window_params = [{transform_indices = @transform_0, window_bounds = array<i64: 6, 256>}, {transform_indices = @transform_1, window_bounds = array<i64: 1, 6, 128>}]} {
    %c0_i32 = arith.constant 0 : i32
    %0 = arith.cmpi eq, %arg2, %c0_i32 : i32
    %1 = arith.extui %0 : i1 to i32
    %c0_i32_0 = arith.constant 0 : i32
    %2 = arith.cmpi ne, %1, %c0_i32_0 : i32
    scf.if %2 {
      %cst_8 = arith.constant 0.000000e+00 : f32
      %12 = vector.broadcast %cst_8 : f32 to vector<6x1xf32>
      %c0_9 = arith.constant 0 : index
      %c0_10 = arith.constant 0 : index
      %13 = vector.load %arg5[%c0_9, %c0_10] : memref<6x1xf32, #tpu.memory_space<vmem>>, vector<6x1xf32>
      tpu.vector_store %arg5[%c0_9, %c0_10], %12 {strides = array<i32>} : memref<6x1xf32, #tpu.memory_space<vmem>>, vector<6x1xf32>,
    } else {
    }
    %c0 = arith.constant 0 : index
    %c0_1 = arith.constant 0 : index
    %3 = vector.load %arg3[%c0, %c0_1] : memref<6x256xf32, #tpu.memory_space<vmem>>, vector<6x256xf32>
    %c0_2 = arith.constant 0 : index
    %c0_3 = arith.constant 0 : index
    %4 = vector.load %arg5[%c0_2, %c0_3] : memref<6x1xf32, #tpu.memory_space<vmem>>, vector<6x1xf32>
    %cst = arith.constant dense<0.000000e+00> : vector<6xf32>
    %5 = vector.multi_reduction <add>, %3, %cst [1] : vector<6x256xf32> to vector<6xf32>
    %6 = vector.shape_cast %5 : vector<6xf32> to vector<6x1xf32>
    %7 = arith.addf %4, %6 : vector<6x1xf32>
    %c0_4 = arith.constant 0 : index
    %c0_5 = arith.constant 0 : index
    %8 = vector.load %arg5[%c0_4, %c0_5] : memref<6x1xf32, #tpu.memory_space<vmem>>, vector<6x1xf32>
    tpu.vector_store %arg5[%c0_4, %c0_5], %7 {strides = array<i32>} : memref<6x1xf32, #tpu.memory_space<vmem>>, vector<6x1xf32>,
    %c0_i32_6 = arith.constant 0 : i32
    %9 = arith.cmpi eq, %arg2, %c0_i32_6 : i32
    %10 = arith.extui %9 : i1 to i32
    %c0_i32_7 = arith.constant 0 : i32
    %11 = arith.cmpi ne, %10, %c0_i32_7 : i32
    scf.if %11 {
      %c0_8 = arith.constant 0 : index
      %c0_9 = arith.constant 0 : index
      %12 = vector.load %arg5[%c0_8, %c0_9] : memref<6x1xf32, #tpu.memory_space<vmem>>, vector<6x1xf32>
      %13 = vector.shape_cast %12 : vector<6x1xf32> to vector<1x6x1xf32>
      %14 = vector.broadcast %13 : vector<1x6x1xf32> to vector<1x6x128xf32>
      %c0_10 = arith.constant 0 : index
      %c0_11 = arith.constant 0 : index
      %c0_12 = arith.constant 0 : index
      %15 = vector.load %arg4[%c0_10, %c0_11, %c0_12] : memref<1x6x128xf32, #tpu.memory_space<vmem>>, vector<1x6x128xf32>
      tpu.vector_store %arg4[%c0_10, %c0_11, %c0_12], %14 {strides = array<i32>} : memref<1x6x128xf32, #tpu.memory_space<vmem>>, vector<1x6x128xf32>,
    } else {
    }
    return
  }
  func.func @transform_0(%arg0: i32, %arg1: i32, %arg2: i32) -> (i32, i32) {
    %c1_i32 = arith.constant 1 : i32
    %0 = arith.muli %arg0, %c1_i32 : i32
    %1 = arith.addi %0, %arg2 : i32
    %c0_i32 = arith.constant 0 : i32
    return %arg1, %1 : i32, i32
  }
  func.func @transform_1(%arg0: i32, %arg1: i32, %arg2: i32) -> (i32, i32, i32) {
    %c0_i32 = arith.constant 0 : i32
    %c0_i32_0 = arith.constant 0 : i32
    return %arg0, %arg1, %c0_i32 : i32, i32, i32
  }
}

</mosaic_0001>

<bundles_post_ra>
// kernel: tpu_custom_call.1
= control target key start
LH: loop header
LB: loop body
LE: loop exit
PB: predicated region body
PF: predicated region fallthrough
CT: control target
= control target key end

     0   :  { %6 = vsyncpa [#allocation4], 0  ;;  %s87_s6 = smov [#allocation3]   ;;  %s115_s0 = inlined_call_operand.hbm [shape: f32[6,256], index: 0, kind: input, shape index: {}]   ;;  %s116_s1 = inlined_call_operand.vmem [shape: f32[1,6,128], index: 1, kind: output, shape index: {}]  }
   0x1   :  { %s17_s7 = sshll.u32 %s87_s6, 4  ;;  %s63_s10 = scalar_lea.hbm %s115_s0, 256  ;;  %s18_s7 = int_to_ptr.vmem [resolvable:$true] %s17_s7 }
   0x2   :  { %p64_p0 = scmp.ne.s32.totalorder %s115_s0, %s63_s10  ;;  %p67_p1 = scmp.lt.u32.totalorder %s63_s10, %s115_s0 }
   0x4   :  { %p69_p2 = pnand %p67_p1, %p64_p0 }
   0x6   :  { %72 = shalt.err (!%p69_p2)
}
   0x7   :  { %s73_s15 = scalar_lea.vmem %s18_s7, 256  ;;  %p78_p4 = scmp.lt.s32.totalorder %s18_s7, %s18_s7 }
   0x8   :  { %p74_p3 = scmp.ne.s32.totalorder %s18_s7, %s73_s15  ;;  %p79_p5 = scmp.lt.s32.totalorder %s73_s15, %s73_s15 }
   0xa   :  { %p80_p6 = por %p79_p5, %p78_p4 }
   0xc   :  { %p81_p7 = pnand %p80_p6, %p74_p3 }
   0xe   :  { %84 = shalt.err (!%p81_p7)
}
   0xf   :  { %20 = dma.hbm_to_vmem [thread:$0]  %s115_s0, 256, %s18_s7, [#allocation4]  }
  0x10   :  { %85 = dma.done.wait [#allocation4], 256  }
  0x11   :  { %86 = vsyncadd [#allocation4], 4294967040  ;;  %vm30_vm0 = vcmask 5120   ;;  %v88_v0 = vmov 0.0   ;;  %vm35_vm1 = vcmask 1045504   ;;  %v89_v6 = vmov 0  }
  0x12   :  { %31 = vst.msk [vmem:[#allocation2] sm:$0x3f] %vm30_vm0, %v88_v0  ;;  %v32_v1 = vld [vmem:[#allocation3] sm:$0x3f]  ;;  %v33_v2 = vld [vmem:[#allocation3 + $0x8] sm:$0x3f]  ;;  %62 = vset.pattern.permute.xlu0 %v89_v6 }
  0x13   :  { %v36_v3 = vsel %vm35_vm1, %v32_v1, 0.0  ;;  %v37_v4 = vsel %vm35_vm1, %v33_v2, 0.0 }
  0x14   :  { %v38_v5 = vadd.f32 %v37_v4, %v36_v3 }
  0x16   :  { %39 = vadd.xlane.f32.xlu0 %v38_v5 }
  0x19   :  { %v34_v7 = vld [vmem:[#allocation2] sm:$0x3f] }
  0xa3   :  { %v40_v8 = vpop.xlane.xlu0 %39 }
  0xa4   :  { %v41_v9 = vadd.f32 %v40_v8, %v34_v7 }
  0xa6   :  { %43 = vst.msk [vmem:[#allocation2] sm:$0x3f] %vm30_vm0, %v41_v9 }
  0xad   :  { %v47_v10 = vld [vmem:[#allocation2] sm:$0x3f] }
  0xae   :  { %50 = vperm.xlu0 %62, %v47_v10  }
 0x12d   :  { %v51_v11 = vpop.permute.xlu0 %50 }
 0x12e   :  { %53 = vst [vmem:[%s116_s1] sm:$0x3f] %v51_v11 }
 0x12f   :  { %58 = vsyncpa [#allocation4], 1 }

</bundles_post_ra>
